<compile_context>
chip_gen: v6e
topology: v6e:2x2x1
jax: 0.10.0
libtpu: 0.0.40
codegen_flags: <defaults>
</compile_context>

<pallas_src>
import functools
import math

import jax
import jax.numpy as jnp
from jax import lax
from jax.experimental import pallas as pl
from jax.experimental.pallas import tpu as pltpu


# ---------------------------------------------------------------------------
# Plain linear: (x @ W + b), W stored as (in, out) == PyTorch weight.T
# ---------------------------------------------------------------------------
def _linear_kernel(x_ref, w_ref, b_ref, o_ref):
    # x_ref: (TM, K), w_ref: (K, N), b_ref: (1, N), o_ref: (TM, N)
    acc = jnp.dot(x_ref[...], w_ref[...], preferred_element_type=jnp.float32)
    o_ref[...] = (acc + b_ref[...]).astype(o_ref.dtype)


def linear_forward(x2d, w, b, *, tm=512):
    """x2d: (M, K); w: (K, N); b: (N,). Returns (M, N)."""
    M, K = x2d.shape
    K2, N = w.shape
    assert K == K2
    tm = min(tm, M)
    b2d = b.reshape(1, N)
    grid = (pl.cdiv(M, tm),)
    return pl.pallas_call(
        _linear_kernel,
        out_shape=jax.ShapeDtypeStruct((M, N), x2d.dtype),
        grid_spec=pltpu.PrefetchScalarGridSpec(
            num_scalar_prefetch=0,
            grid=grid,
            in_specs=[
                pl.BlockSpec((tm, K), lambda i: (i, 0)),
                pl.BlockSpec((K, N), lambda i: (0, 0)),   # weight resident in VMEM
                pl.BlockSpec((1, N), lambda i: (0, 0)),
            ],
            out_specs=pl.BlockSpec((tm, N), lambda i: (i, 0)),
        ),
        compiler_params=pltpu.CompilerParams(
            dimension_semantics=("parallel",)),
    )(x2d, w, b2d)


# ---------------------------------------------------------------------------
# Fused QKV projection: one matmul vs (K, 3N) weight, three lane-dense outputs.
# ---------------------------------------------------------------------------
def _qkv_kernel(x_ref, w_ref, b_ref, oq_ref, ok_ref, ov_ref):
    acc = jnp.dot(x_ref[...], w_ref[...], preferred_element_type=jnp.float32)
    acc = acc + b_ref[...]
    n = oq_ref.shape[-1]
    oq_ref[...] = acc[:, :n].astype(oq_ref.dtype)
    ok_ref[...] = acc[:, n:2 * n].astype(ok_ref.dtype)
    ov_ref[...] = acc[:, 2 * n:].astype(ov_ref.dtype)


def qkv_projection(x2d, w_qkv, b_qkv, *, tm=512):
    """x2d: (M, K); w_qkv: (K, 3N); b_qkv: (3N,). Returns (q, k, v), each (M, N)."""
    M, K = x2d.shape
    K2, N3 = w_qkv.shape
    assert K == K2 and N3 % 3 == 0
    N = N3 // 3
    tm = min(tm, M)
    b2d = b_qkv.reshape(1, N3)
    grid = (pl.cdiv(M, tm),)
    out_sds = jax.ShapeDtypeStruct((M, N), x2d.dtype)
    return pl.pallas_call(
        _qkv_kernel,
        out_shape=(out_sds, out_sds, out_sds),
        grid_spec=pltpu.PrefetchScalarGridSpec(
            num_scalar_prefetch=0,
            grid=grid,
            in_specs=[
                pl.BlockSpec((tm, K), lambda i: (i, 0)),
                pl.BlockSpec((K, N3), lambda i: (0, 0)),  # fused weight resident
                pl.BlockSpec((1, N3), lambda i: (0, 0)),
            ],
            out_specs=[
                pl.BlockSpec((tm, N), lambda i: (i, 0)),
                pl.BlockSpec((tm, N), lambda i: (i, 0)),
                pl.BlockSpec((tm, N), lambda i: (i, 0)),
            ],
        ),
        compiler_params=pltpu.CompilerParams(
            dimension_semantics=("parallel",)),
    )(x2d, w_qkv, b2d)


# ---------------------------------------------------------------------------
# Flash-style multi-head attention: lane-dense (B, S, size) in / out, heads
# split/merged inside the kernel, online softmax over the kv grid axis.
# ---------------------------------------------------------------------------
def _mha_flash_kernel(q_ref, k_ref, v_ref, mask_ref, o_ref,
                      m_sc, l_sc, acc_sc, *, heads, vec, scale):
    ki = pl.program_id(2)
    nk = pl.num_programs(2)

    @pl.when(ki == 0)
    def _():
        m_sc[...] = jnp.full(m_sc.shape, -jnp.inf, dtype=m_sc.dtype)
        l_sc[...] = jnp.zeros(l_sc.shape, dtype=l_sc.dtype)
        acc_sc[...] = jnp.zeros(acc_sc.shape, dtype=acc_sc.dtype)

    # Lane-dense (tq, size) / (tk, size) tiles; bf16 MXU operands, f32 accum.
    # 1/sqrt(vec) folded into q (touches Sq*size elements, not Sq*Sk).
    qb = (q_ref[0] * scale).astype(jnp.bfloat16)        # (tq, size)
    kb = k_ref[0].astype(jnp.bfloat16)                  # (tk, size)
    vb = v_ref[0].astype(jnp.bfloat16)                  # (tk, size)
    msk = mask_ref[0, 0]                                # (tq, tk) int8

    for h in range(heads):                              # static per-head slices
        hs = h * vec
        he = hs + vec
        q_h = qb[:, hs:he]                              # (tq, vec) bf16
        k_h = kb[:, hs:he]                              # (tk, vec) bf16
        # Q K^T, contracting over vec, f32 accumulation on the MXU.
        s = lax.dot_general(q_h, k_h, (((1,), (1,)), ((), ())),
                            preferred_element_type=jnp.float32)   # (tq, tk)
        s = jnp.where(msk == 0, -1e9, s)

        m_prev = m_sc[h]                                # (tq, 1)
        m_new = jnp.maximum(m_prev, jnp.max(s, axis=-1, keepdims=True))
        alpha = jnp.exp(m_prev - m_new)
        p = jnp.exp(s - m_new)                          # (tq, tk) f32
        l_sc[h] = alpha * l_sc[h] + jnp.sum(p, axis=-1, keepdims=True)
        pv = jnp.dot(p.astype(jnp.bfloat16), vb[:, hs:he],
                     preferred_element_type=jnp.float32)          # (tq, vec)
        acc_sc[h] = alpha * acc_sc[h] + pv
        m_sc[h] = m_new

    @pl.when(ki == nk - 1)
    def _():
        cols = []
        for h in range(heads):
            inv = pl.reciprocal(l_sc[h], approx=True)   # divide on the EUP slot
            cols.append(acc_sc[h] * inv)
        # Merge heads in-kernel -> single lane-dense (tq, size) store.
        o_ref[0] = jnp.concatenate(cols, axis=-1).astype(o_ref.dtype)


def mha_attention(q, k, v, mask, heads, *, tq=None, tk=None):
    """q: (B, Sq, size); k/v: (B, Sk, size); mask: (B or 1, 1, Sq, Sk) or None.
    Returns (B, Sq, size) with heads already merged."""
    B, Sq, size = q.shape
    Sk = k.shape[1]
    vec = size // heads
    scale = 1.0 / math.sqrt(vec)

    if mask is None:
        mask = jnp.ones((1, 1, Sq, Sk), jnp.int8)
    mask = (mask != 0).astype(jnp.int8)                 # 4x fewer mask DMA bytes

    if tq is None:
        tq = Sq if Sq <= 256 else 256
    if tk is None:
        tk = Sk if Sk <= 512 else 512
    assert Sq % tq == 0 and Sk % tk == 0, (Sq, tq, Sk, tk)
    nq, nk = Sq // tq, Sk // tk

    # Batch-invariant mask -> constant batch index (DMA'd once per (qi, ki)).
    if mask.shape[0] == 1:
        mask_idx = lambda b, qi, ki: (0, 0, qi, ki)
    else:
        mask_idx = lambda b, qi, ki: (b, 0, qi, ki)

    kernel = functools.partial(_mha_flash_kernel, heads=heads, vec=vec, scale=scale)
    return pl.pallas_call(
        kernel,
        out_shape=jax.ShapeDtypeStruct((B, Sq, size), q.dtype),
        grid_spec=pltpu.PrefetchScalarGridSpec(
            num_scalar_prefetch=0,
            grid=(B, nq, nk),
            in_specs=[
                pl.BlockSpec((1, tq, size), lambda b, qi, ki: (b, qi, 0)),
                pl.BlockSpec((1, tk, size), lambda b, qi, ki: (b, ki, 0)),
                pl.BlockSpec((1, tk, size), lambda b, qi, ki: (b, ki, 0)),
                pl.BlockSpec((1, 1, tq, tk), mask_idx),
            ],
            out_specs=pl.BlockSpec((1, tq, size), lambda b, qi, ki: (b, qi, 0)),
            scratch_shapes=[
                pltpu.VMEM((heads, tq, 1), jnp.float32),    # running max m
                pltpu.VMEM((heads, tq, 1), jnp.float32),    # running sum l
                pltpu.VMEM((heads, tq, vec), jnp.float32),  # output accumulator
            ],
        ),
        compiler_params=pltpu.CompilerParams(
            dimension_semantics=("parallel", "parallel", "arbitrary")),
    )(q, k, v, mask)


# ---------------------------------------------------------------------------
# Full MultiHeadAttention forward.
# ---------------------------------------------------------------------------
def multi_head_attention_forward(query, key, value, mask, params, heads):
    B, Sq, size = query.shape
    Sk = key.shape[1]

    if (query is key) and (key is value):
        # Self-attention: single fused QKV matmul (one launch, x read once),
        # outputs already in the (B, S, size) layout the attention kernel uses.
        w_qkv = jnp.concatenate([params["w_q"], params["w_k"], params["w_v"]], axis=1)
        b_qkv = jnp.concatenate([params["b_q"], params["b_k"], params["b_v"]])
        q2d, k2d, v2d = qkv_projection(query.reshape(B * Sq, size), w_qkv, b_qkv)
        q = q2d.reshape(B, Sq, size)
        k = k2d.reshape(B, Sk, size)
        v = v2d.reshape(B, Sk, size)
    else:
        def proj(x, w, b):
            m = x.shape[0] * x.shape[1]
            return linear_forward(x.reshape(m, size), w, b).reshape(x.shape)
        q = proj(query, params["w_q"], params["b_q"])
        k = proj(key, params["w_k"], params["b_k"])
        v = proj(value, params["w_v"], params["b_v"])

    # Attention with in-kernel head split/merge: no wrapper transposes at all.
    ctx = mha_attention(q, k, v, mask, heads)           # (B, Sq, size)

    out = linear_forward(ctx.reshape(B * Sq, size), params["w_o"], params["b_o"])
    return out.reshape(B, Sq, size)


if __name__ == "__main__":
    SIZE = 128          # model dimension (lane-aligned)
    HEADS = 4
    VEC = SIZE // HEADS
    B, S = 2, 8
    DROPOUT_RATE = 0.0  # eval-mode / zero-rate dropout == identity

    key = jax.random.PRNGKey(0)
    keys = jax.random.split(key, 9)
    init = 1.0 / math.sqrt(SIZE)

    def mk_w(k):  # stored as (in, out) == PyTorch nn.Linear weight.T
        return jax.random.uniform(k, (SIZE, SIZE), jnp.float32, -init, init)

    def mk_b(k):
        return jax.random.uniform(k, (SIZE,), jnp.float32, -init, init)

    params = {
        "w_q": mk_w(keys[0]), "b_q": mk_b(keys[1]),
        "w_k": mk_w(keys[2]), "b_k": mk_b(keys[3]),
        "w_v": mk_w(keys[4]), "b_v": mk_b(keys[5]),
        "w_o": mk_w(keys[6]), "b_o": mk_b(keys[7]),
    }

    # Self-attention input (exercises the fused QKV path).
    x = jax.random.normal(keys[8], (B, S, SIZE), dtype=jnp.float32)

    # Causal mask, batch-invariant (1, 1, S, S) int8: 1 = keep, 0 = masked out.
    mask = jnp.tril(jnp.ones((S, S), jnp.int8)).reshape(1, 1, S, S)

    out = multi_head_attention_forward(x, x, x, mask, params, HEADS)
    out = jax.block_until_ready(out)

    # Pure-JAX f32 reference (same intended-mask semantics).
    def ref_forward(q_in, k_in, v_in, msk, p):
        q = q_in @ p["w_q"] + p["b_q"]
        k = k_in @ p["w_k"] + p["b_k"]
        v = v_in @ p["w_v"] + p["b_v"]
        qh = q.reshape(B, S, HEADS, VEC).transpose(0, 2, 1, 3)
        kh = k.reshape(B, S, HEADS, VEC).transpose(0, 2, 1, 3)
        vh = v.reshape(B, S, HEADS, VEC).transpose(0, 2, 1, 3)
        scores = jnp.einsum("bhqd,bhkd->bhqk", qh, kh) / math.sqrt(VEC)
        scores = jnp.where(msk == 0, -1e9, scores)
        probs = jax.nn.softmax(scores, axis=-1)
        ctx = jnp.einsum("bhqk,bhkd->bhqd", probs, vh)
        ctx = ctx.transpose(0, 2, 1, 3).reshape(B, S, SIZE)
        return ctx @ p["w_o"] + p["b_o"]

    ref = ref_forward(x, x, x, mask, params)
    assert out.shape == (B, S, SIZE), out.shape
    max_err = float(jnp.max(jnp.abs(out - ref)))
    assert jnp.allclose(out, ref, atol=2e-2, rtol=2e-2), (
        f"mismatch vs reference (max abs err {max_err})")

    print("KERNEL_OK")
</pallas_src>

<mosaic_0001>
module attributes {stable_mosaic.version = 11 : i64} {
  func.func @_qkv_kernel(%arg0: i32, %arg1: memref<16x128xf32, #tpu.memory_space<vmem>>, %arg2: memref<128x384xf32, #tpu.memory_space<vmem>>, %arg3: memref<1x384xf32, #tpu.memory_space<vmem>>, %arg4: memref<16x128xf32, #tpu.memory_space<vmem>>, %arg5: memref<16x128xf32, #tpu.memory_space<vmem>>, %arg6: memref<16x128xf32, #tpu.memory_space<vmem>>) attributes {dimension_semantics = [#tpu.dimension_semantics<parallel>], iteration_bounds = array<i64: 1>, scalar_prefetch = 0 : i64, scratch_operands = 0 : i64, tpu.core_type = #tpu.core_type<tc>, window_params = [{transform_indices = @transform_0, window_bounds = array<i64: 16, 128>}, {pipeline_mode = #tpu.pipeline_mode<synchronous>, transform_indices = @transform_1, window_bounds = array<i64: 128, 384>}, {pipeline_mode = #tpu.pipeline_mode<synchronous>, transform_indices = @transform_2, window_bounds = array<i64: 1, 384>}, {transform_indices = @transform_3, window_bounds = array<i64: 16, 128>}, {transform_indices = @transform_4, window_bounds = array<i64: 16, 128>}, {transform_indices = @transform_5, window_bounds = array<i64: 16, 128>}]} {
    %c0 = arith.constant 0 : index
    %c0_0 = arith.constant 0 : index
    %0 = vector.load %arg1[%c0, %c0_0] : memref<16x128xf32, #tpu.memory_space<vmem>>, vector<16x128xf32>
    %c0_1 = arith.constant 0 : index
    %c0_2 = arith.constant 0 : index
    %1 = vector.load %arg2[%c0_1, %c0_2] : memref<128x384xf32, #tpu.memory_space<vmem>>, vector<128x384xf32>
    %cst = arith.constant dense<0.000000e+00> : vector<16x384xf32>
    %2 = tpu.matmul %0, %1, %cst {dimension_numbers = #tpu.dot_dimension_numbers<[1], [0], [0], [1], [0, 0, 1, 1], [], []>} : vector<16x128xf32>, vector<128x384xf32>, vector<16x384xf32> -> vector<16x384xf32>
    %c0_3 = arith.constant 0 : index
    %c0_4 = arith.constant 0 : index
    %3 = vector.load %arg3[%c0_3, %c0_4] : memref<1x384xf32, #tpu.memory_space<vmem>>, vector<1x384xf32>
    %4 = vector.broadcast %3 : vector<1x384xf32> to vector<16x384xf32>
    %5 = arith.addf %2, %4 : vector<16x384xf32>
    %6 = vector.extract_strided_slice %5 {offsets = [0, 0], sizes = [16, 128], strides = [1, 1]} : vector<16x384xf32> to vector<16x128xf32>
    %c0_5 = arith.constant 0 : index
    %c0_6 = arith.constant 0 : index
    %7 = vector.load %arg4[%c0_5, %c0_6] : memref<16x128xf32, #tpu.memory_space<vmem>>, vector<16x128xf32>
    tpu.vector_store %arg4[%c0_5, %c0_6], %6 {strides = array<i32>} : memref<16x128xf32, #tpu.memory_space<vmem>>, vector<16x128xf32>,
    %8 = vector.extract_strided_slice %5 {offsets = [0, 128], sizes = [16, 128], strides = [1, 1]} : vector<16x384xf32> to vector<16x128xf32>
    %c0_7 = arith.constant 0 : index
    %c0_8 = arith.constant 0 : index
    %9 = vector.load %arg5[%c0_7, %c0_8] : memref<16x128xf32, #tpu.memory_space<vmem>>, vector<16x128xf32>
    tpu.vector_store %arg5[%c0_7, %c0_8], %8 {strides = array<i32>} : memref<16x128xf32, #tpu.memory_space<vmem>>, vector<16x128xf32>,
    %10 = vector.extract_strided_slice %5 {offsets = [0, 256], sizes = [16, 128], strides = [1, 1]} : vector<16x384xf32> to vector<16x128xf32>
    %c0_9 = arith.constant 0 : index
    %c0_10 = arith.constant 0 : index
    %11 = vector.load %arg6[%c0_9, %c0_10] : memref<16x128xf32, #tpu.memory_space<vmem>>, vector<16x128xf32>
    tpu.vector_store %arg6[%c0_9, %c0_10], %10 {strides = array<i32>} : memref<16x128xf32, #tpu.memory_space<vmem>>, vector<16x128xf32>,
    return
  }
  func.func @transform_0(%arg0: i32) -> (i32, i32) {
    %c0_i32 = arith.constant 0 : i32
    %c0_i32_0 = arith.constant 0 : i32
    return %arg0, %c0_i32 : i32, i32
  }
  func.func @transform_1(%arg0: i32) -> (i32, i32) {
    %c0_i32 = arith.constant 0 : i32
    %c0_i32_0 = arith.constant 0 : i32
    %c0_i32_1 = arith.constant 0 : i32
    return %c0_i32, %c0_i32_0 : i32, i32
  }
  func.func @transform_2(%arg0: i32) -> (i32, i32) {
    %c0_i32 = arith.constant 0 : i32
    %c0_i32_0 = arith.constant 0 : i32
    %c0_i32_1 = arith.constant 0 : i32
    return %c0_i32, %c0_i32_0 : i32, i32
  }
  func.func @transform_3(%arg0: i32) -> (i32, i32) {
    %c0_i32 = arith.constant 0 : i32
    %c0_i32_0 = arith.constant 0 : i32
    return %arg0, %c0_i32 : i32, i32
  }
  func.func @transform_4(%arg0: i32) -> (i32, i32) {
    %c0_i32 = arith.constant 0 : i32
    %c0_i32_0 = arith.constant 0 : i32
    return %arg0, %c0_i32 : i32, i32
  }
  func.func @transform_5(%arg0: i32) -> (i32, i32) {
    %c0_i32 = arith.constant 0 : i32
    %c0_i32_0 = arith.constant 0 : i32
    return %arg0, %c0_i32 : i32, i32
  }
}

</mosaic_0001>

<bundles_post_ra>
// kernel: tpu_custom_call.1
= control target key start
LH: loop header
LB: loop body
LE: loop exit
PB: predicated region body
PF: predicated region fallthrough
CT: control target
= control target key end

     0   :  { %11 = vsyncpa [#allocation3], 0  ;;  %s564_s0 = inlined_call_operand.hbm [shape: f32[16,128], index: 0, kind: input, shape index: {}]   ;;  %s565_s1 = inlined_call_operand.hbm [shape: f32[128,384], index: 1, kind: input, shape index: {}]   ;;  %s566_s2 = inlined_call_operand.vmem [shape: f32[1,384], index: 2, kind: input, shape index: {}]   ;;  %s567_s3 = inlined_call_operand.hbm [shape: f32[16,128], index: 3, kind: output, shape index: {0}]   ;;  %s568_s4 = inlined_call_operand.hbm [shape: f32[16,128], index: 4, kind: output, shape index: {1}]   ;;  %s569_s5 = inlined_call_operand.hbm [shape: f32[16,128], index: 5, kind: output, shape index: {2}]  }
   0x1   :  { %12 = vsyncpa [#allocation6], 0 }
   0x2   :  { %13 = vsyncpa [#allocation4], 0 }
   0x3   :  { %14 = vsyncpa [#allocation9], 0  ;;  %s492_s18 = smov [#allocation2]  }
   0x4   :  { %s20_s19 = sshll.u32 %s492_s18, 4  ;;  %s21_s19 = int_to_ptr.vmem [resolvable:$true] %s20_s19 }
   0x5   :  { %s392_s20 = scalar_lea.vmem %s21_s19, 256  ;;  %p397_p1 = scmp.lt.s32.totalorder %s21_s19, %s21_s19 }
   0x6   :  { %p393_p0 = scmp.ne.s32.totalorder %s21_s19, %s392_s20  ;;  %p398_p2 = scmp.lt.s32.totalorder %s392_s20, %s392_s20 }
   0x8   :  { %p399_p3 = por %p398_p2, %p397_p1 }
   0xa   :  { %p400_p4 = pnand %p399_p3, %p393_p0 }
   0xc   :  { %403 = shalt.err (!%p400_p4)
}
   0xd   :  { %s493_s21 = smov 128   ;;  %s494_s22 = smov 8  }
   0xe   :  { %26 = dma.hbm_to_vmem [thread:$0]  %s564_s0, 256, %s21_s19, [#allocation3], %s493_s21, %s493_s21, %s494_s22  }
   0xf   :  { %s495_s25 = smov [#allocation5]  }
  0x10   :  { %s32_s26 = sshll.u32 %s495_s25, 4  ;;  %s33_s26 = int_to_ptr.vmem [resolvable:$true] %s32_s26 }
  0x11   :  { %s412_s27 = scalar_lea.vmem %s33_s26, 6144  ;;  %p417_p6 = scmp.lt.s32.totalorder %s33_s26, %s33_s26 }
  0x12   :  { %p413_p5 = scmp.ne.s32.totalorder %s33_s26, %s412_s27  ;;  %p418_p7 = scmp.lt.s32.totalorder %s412_s27, %s412_s27 }
  0x14   :  { %p419_p8 = por %p418_p7, %p417_p6 }
  0x16   :  { %p420_p9 = pnand %p419_p8, %p413_p5 }
  0x18   :  { %423 = shalt.err (!%p420_p9)
}
  0x19   :  { %s496_s28 = smov 384   ;;  %s497_s29 = smov 24  }
  0x1a   :  { %38 = dma.hbm_to_vmem [thread:$0]  %s565_s1, 6144, %s33_s26, [#allocation6], %s496_s28, %s496_s28, %s497_s29  }
  0x1b   :  { %484 = dma.done.wait [#allocation3], 256  }
  0x1c   :  { %485 = vsyncadd [#allocation3], 4294967040 }
  0x1d   :  { %486 = dma.done.wait [#allocation6], 6144  }
  0x1e   :  { %487 = vsyncadd [#allocation6], 4294961152  ;;  %v498_v0 = vmov 0.0   ;;  %v95_v1 = vld [vmem:[#allocation5 + $0x170] sm:$0xff]  ;;  %v94_v2 = vld [vmem:[#allocation5 + $0x168] sm:$0xff]  ;;  %v99_v51 = vlaneseq  ;;  %s499_s7 = smov [#allocation7]  }
  0x1f   :  { %178 = vmatprep.mubr.f32.mxu0 %v498_v0  ;;  %v92_v3 = vld [vmem:[#allocation5 + $0x158] sm:$0xff]  ;;  %114 = vmatprep.subr.mxu0 %v95_v1  ;;  %v91_v4 = vld [vmem:[#allocation5 + $0x150] sm:$0xff]  ;;  %v89_v6 = vld [vmem:[#allocation5 + $0x140] sm:$0xff]  ;;  %s277_s8 = sshll.u32 %s499_s7, 4  ;;  %s500_s9 = smov [#allocation8]   ;;  %s278_s8 = int_to_ptr.vmem [resolvable:$true] %s277_s8 }
  0x20   :  { %v96_v5 = vld [vmem:[#allocation5 + $0x178] sm:$0xff]  ;;  %115 = vmatpush1.msra.mxu0 %v94_v2  ;;  %v93_v7 = vld [vmem:[#allocation5 + $0x160] sm:$0xff]  ;;  %v90_v9 = vld [vmem:[#allocation5 + $0x148] sm:$0xff]  ;;  %v100_v52 = vshrl.u32 %v99_v51, 7  ;;  %s289_s10 = sshll.u32 %s500_s9, 4  ;;  %s501_s11 = smov [#allocation10]   ;;  %s290_s10 = int_to_ptr.vmem [resolvable:$true] %s289_s10 }
  0x21   :  { %339 = vmatprep.subr.mxu1 %v96_v5  ;;  %116 = vmatprep.subr.mxu0 %v92_v3  ;;  %v88_v8 = vld [vmem:[#allocation5 + $0x138] sm:$0xff]  ;;  %v86_v10 = vld [vmem:[#allocation5 + $0x128] sm:$0xff]  ;;  %v85_v11 = vld [vmem:[#allocation5 + $0x120] sm:$0xff]  ;;  %s424_s12 = scalar_lea.vmem %s278_s8, 256  ;;  %p429_p11 = scmp.lt.s32.totalorder %s278_s8, %s278_s8 }
  0x22   :  { %340 = vmatpush3.msra.mxu1 %v96_v5  ;;  %117 = vmatpush1.msra.mxu0 %v91_v4  ;;  %v87_v12 = vld [vmem:[#allocation5 + $0x130] sm:$0xff]  ;;  %v82_v14 = vld [vmem:[#allocation5 + $0x108] sm:$0xff]  ;;  %v84_v15 = vld [vmem:[#allocation5 + $0x118] sm:$0xff]  ;;  %v101_v53 = vsub.s32 0, %v100_v52  ;;  %v105_v55 = vsub.s32 1, %v100_v52  ;;  %v109_v56 = vsub.s32 2, %v100_v52  ;;  %p425_p10 = scmp.ne.s32.totalorder %s278_s8, %s424_s12  ;;  %p430_p12 = scmp.lt.s32.totalorder %s424_s12, %s424_s12 }
  0x23   :  { %341 = vmatprep.subr.mxu1 %v93_v7  ;;  %118 = vmatprep.subr.mxu0 %v89_v6  ;;  %v83_v13 = vld [vmem:[#allocation5 + $0x110] sm:$0xff]  ;;  %v80_v16 = vld [vmem:[#allocation5 + $0xf8] sm:$0xff]  ;;  %v81_v18 = vld [vmem:[#allocation5 + $0x100] sm:$0xff] }
  0x24   :  { %342 = vmatpush3.msra.mxu1 %v93_v7  ;;  %119 = vmatpush1.msra.mxu0 %v88_v8  ;;  %v79_v17 = vld [vmem:[#allocation5 + $0xf0] sm:$0xff]  ;;  %v77_v19 = vld [vmem:[#allocation5 + $0xe0] sm:$0xff]  ;;  %v76_v20 = vld [vmem:[#allocation5 + $0xd8] sm:$0xff]  ;;  %p431_p13 = por %p430_p12, %p429_p11 }
  0x25   :  { %343 = vmatprep.subr.mxu1 %v90_v9  ;;  %120 = vmatprep.subr.mxu0 %v86_v10  ;;  %v78_v21 = vld [vmem:[#allocation5 + $0xe8] sm:$0xff]  ;;  %v73_v23 = vld [vmem:[#allocation5 + $0xc0] sm:$0xff]  ;;  %v75_v24 = vld [vmem:[#allocation5 + $0xd0] sm:$0xff] }
  0x26   :  { %344 = vmatpush3.msra.mxu1 %v90_v9  ;;  %121 = vmatpush1.msra.mxu0 %v85_v11  ;;  %v74_v22 = vld [vmem:[#allocation5 + $0xc8] sm:$0xff]  ;;  %v71_v25 = vld [vmem:[#allocation5 + $0xb0] sm:$0xff]  ;;  %v72_v27 = vld [vmem:[#allocation5 + $0xb8] sm:$0xff]  ;;  %p432_p0 = pnand %p431_p13, %p425_p10 }
  0x27   :  { %345 = vmatprep.subr.mxu1 %v87_v12  ;;  %122 = vmatprep.subr.mxu0 %v83_v13  ;;  %v70_v26 = vld [vmem:[#allocation5 + $0xa8] sm:$0xff]  ;;  %v68_v28 = vld [vmem:[#allocation5 + $0x98] sm:$0xff]  ;;  %v67_v29 = vld [vmem:[#allocation5 + $0x90] sm:$0xff] }
  0x28   :  { %346 = vmatpush3.msra.mxu1 %v87_v12  ;;  %123 = vmatpush1.msra.mxu0 %v82_v14  ;;  %v69_v30 = vld [vmem:[#allocation5 + $0xa0] sm:$0xff]  ;;  %v64_v32 = vld [vmem:[#allocation5 + $0x78] sm:$0xff]  ;;  %v66_v33 = vld [vmem:[#allocation5 + $0x88] sm:$0xff] }
  0x29   :  { %347 = vmatprep.subr.mxu1 %v84_v15  ;;  %124 = vmatprep.subr.mxu0 %v80_v16  ;;  %v65_v31 = vld [vmem:[#allocation5 + $0x80] sm:$0xff]  ;;  %v62_v34 = vld [vmem:[#allocation5 + $0x68] sm:$0xff]  ;;  %v63_v36 = vld [vmem:[#allocation5 + $0x70] sm:$0xff] }
  0x2a   :  { %348 = vmatpush3.msra.mxu1 %v84_v15  ;;  %125 = vmatpush1.msra.mxu0 %v79_v17  ;;  %v61_v35 = vld [vmem:[#allocation5 + $0x60] sm:$0xff]  ;;  %v59_v37 = vld [vmem:[#allocation5 + $0x50] sm:$0xff]  ;;  %v58_v38 = vld [vmem:[#allocation5 + $0x48] sm:$0xff] }
  0x2b   :  { %349 = vmatprep.subr.mxu1 %v81_v18  ;;  %126 = vmatprep.subr.mxu0 %v77_v19  ;;  %v60_v39 = vld [vmem:[#allocation5 + $0x58] sm:$0xff]  ;;  %v55_v41 = vld [vmem:[#allocation5 + $0x30] sm:$0xff]  ;;  %v57_v42 = vld [vmem:[#allocation5 + $0x40] sm:$0xff] }
  0x2c   :  { %350 = vmatpush3.msra.mxu1 %v81_v18  ;;  %127 = vmatpush1.msra.mxu0 %v76_v20  ;;  %v56_v40 = vld [vmem:[#allocation5 + $0x38] sm:$0xff]  ;;  %v53_v43 = vld [vmem:[#allocation5 + $0x20] sm:$0xff]  ;;  %v54_v45 = vld [vmem:[#allocation5 + $0x28] sm:$0xff] }
  0x2d   :  { %351 = vmatprep.subr.mxu1 %v78_v21  ;;  %128 = vmatprep.subr.mxu0 %v74_v22  ;;  %v52_v44 = vld [vmem:[#allocation5 + $0x18] sm:$0xff]  ;;  %v50_v46 = vld [vmem:[#allocation5 + $0x8] sm:$0xff]  ;;  %v49_v47 = vld [vmem:[#allocation5] sm:$0xff] }
  0x2e   :  { %352 = vmatpush3.msra.mxu1 %v78_v21  ;;  %129 = vmatpush1.msra.mxu0 %v73_v23  ;;  %v51_v48 = vld [vmem:[#allocation5 + $0x10] sm:$0xff]  ;;  %v48_v50 = vld [vmem:[#allocation2 + $0x8] sm:$0xff] }
  0x2f   :  { %353 = vmatprep.subr.mxu1 %v75_v24  ;;  %130 = vmatprep.subr.mxu0 %v71_v25  ;;  %v47_v49 = vld [vmem:[#allocation2] sm:$0xff] }
  0x30   :  { %354 = vmatpush3.msra.mxu1 %v75_v24  ;;  %131 = vmatpush1.msra.mxu0 %v70_v26  ;;  %v97_v54 = vld [vmem:[%s566_s2] sm:$0x7]  ;;  %s301_s2 = sshll.u32 %s501_s11, 4  ;;  %s302_s2 = int_to_ptr.vmem [resolvable:$true] %s301_s2 }
  0x31   :  { %355 = vmatprep.subr.mxu1 %v72_v27  ;;  %132 = vmatprep.subr.mxu0 %v68_v28  ;;  %v102_v57 = vrot.slane %v97_v54, %v101_v53  ;;  %v106_v58 = vrot.slane %v97_v54, %v105_v55  ;;  %v110_v59 = vrot.slane %v97_v54, %v109_v56 }
  0x32   :  { %356 = vmatpush3.msra.mxu1 %v72_v27  ;;  %133 = vmatpush1.msra.mxu0 %v67_v29 }
  0x33   :  { %357 = vmatprep.subr.mxu1 %v69_v30  ;;  %134 = vmatprep.subr.mxu0 %v65_v31 }
  0x34   :  { %358 = vmatpush3.msra.mxu1 %v69_v30  ;;  %135 = vmatpush1.msra.mxu0 %v64_v32 }
  0x35   :  { %359 = vmatprep.subr.mxu1 %v66_v33  ;;  %136 = vmatprep.subr.mxu0 %v62_v34 }
  0x36   :  { %360 = vmatpush3.msra.mxu1 %v66_v33  ;;  %137 = vmatpush1.msra.mxu0 %v61_v35 }
  0x37   :  { %361 = vmatprep.subr.mxu1 %v63_v36  ;;  %138 = vmatprep.subr.mxu0 %v59_v37 }
  0x38   :  { %362 = vmatpush3.msra.mxu1 %v63_v36  ;;  %139 = vmatpush1.msra.mxu0 %v58_v38 }
  0x39   :  { %363 = vmatprep.subr.mxu1 %v60_v39  ;;  %140 = vmatprep.subr.mxu0 %v56_v40 }
  0x3a   :  { %364 = vmatpush3.msra.mxu1 %v60_v39  ;;  %141 = vmatpush1.msra.mxu0 %v55_v41 }
  0x3b   :  { %365 = vmatprep.subr.mxu1 %v57_v42  ;;  %142 = vmatprep.subr.mxu0 %v53_v43 }
  0x3c   :  { %366 = vmatpush3.msra.mxu1 %v57_v42  ;;  %143 = vmatpush1.msra.mxu0 %v52_v44 }
  0x3d   :  { %367 = vmatprep.subr.mxu1 %v54_v45  ;;  %144 = vmatprep.subr.mxu0 %v50_v46 }
  0x3e   :  { %368 = vmatpush3.msra.mxu1 %v54_v45  ;;  %145 = vmatpush1.msra.mxu0 %v49_v47 }
  0x3f   :  { %369 = vmatprep.subr.mxu1 %v51_v48  ;;  %179 = vmatmul.mubr.f32.vlgmr.msra.gmra.mxu0 %v47_v49 }
  0x40   :  { %370 = vmatpush3.msra.mxu1 %v51_v48  ;;  %371 = vmatprep.mubr.f32.mxu1 %v47_v49 }
  0x41   :  { %184 = vmatprep.mubr.f32.mxu0 %v498_v0  ;;  %372 = vmatmul.mubr.f32.vlgmr.msra.gmra.mxu1 %v48_v50 }
  0x43   :  { %185 = vmatmul.mubr.f32.gmra.mxu0 %v48_v50 }
  0xff   :  { %v180_v60 = vpop.f32.mrf.mxu0 }
 0x100   :  { %v181_v61 = vadd.f32 %v180_v60, %v102_v57 }
 0x101   :  { %v182_v62 = vpop.f32.mrf.mxu0  ;;  %v373_v63 = vpop.f32.mrf.mxu1 }
 0x102   :  { %266 = vst [vmem:[#allocation7] sm:$0xff] %v181_v61  ;;  %v183_v0 = vadd.f32 %v182_v62, %v106_v58  ;;  %v263_v1 = vadd.f32 %v373_v63, %v110_v59 }
 0x103   :  { %v186_v2 = vpop.f32.mrf.mxu0  ;;  %v257_v3 = vpop.f32.mrf.mxu1 }
 0x104   :  { %268 = vst [vmem:[#allocation8] sm:$0xff] %v183_v0  ;;  %271 = vst [vmem:[#allocation10 + $0x8] sm:$0xff] %v263_v1  ;;  %v187_v4 = vadd.f32 %v186_v2, %v102_v57  ;;  %v258_v5 = vadd.f32 %v257_v3, %v110_v59 }
 0x105   :  { %v188_v6 = vpop.f32.mrf.mxu0 }
 0x106   :  { %267 = vst [vmem:[#allocation7 + $0x8] sm:$0xff] %v187_v4  ;;  %270 = vst [vmem:[#allocation10] sm:$0xff] %v258_v5  ;;  %v189_v7 = vadd.f32 %v188_v6, %v106_v58 }
 0x107   :  { %435 = shalt.err (!%p432_p0)
}
 0x108   :  { %283 = dma.vmem_to_hbm [thread:$0]  %s278_s8, 256, %s567_s3, [#allocation4], %s493_s21, %s493_s21, %s494_s22   ;;  %269 = vst [vmem:[#allocation8 + $0x8] sm:$0xff] %v189_v7 }
 0x109   :  { %s444_s15 = scalar_lea.vmem %s290_s10, 256  ;;  %p449_p2 = scmp.lt.s32.totalorder %s290_s10, %s290_s10 }
 0x10a   :  { %p445_p1 = scmp.ne.s32.totalorder %s290_s10, %s444_s15  ;;  %p450_p3 = scmp.lt.s32.totalorder %s444_s15, %s444_s15 }
 0x10c   :  { %p451_p4 = por %p450_p3, %p449_p2 }
 0x10e   :  { %p452_p5 = pnand %p451_p4, %p445_p1 }
 0x110   :  { %455 = shalt.err (!%p452_p5)
}
 0x111   :  { %295 = dma.vmem_to_hbm [thread:$0]  %s290_s10, 256, %s568_s4, [#allocation9], %s493_s21, %s493_s21, %s494_s22  }
 0x112   :  { %s464_s18 = scalar_lea.vmem %s302_s2, 256  ;;  %p469_p7 = scmp.lt.s32.totalorder %s302_s2, %s302_s2 }
 0x113   :  { %p465_p6 = scmp.ne.s32.totalorder %s302_s2, %s464_s18  ;;  %p470_p8 = scmp.lt.s32.totalorder %s464_s18, %s464_s18 }
 0x115   :  { %p471_p9 = por %p470_p8, %p469_p7 }
 0x117   :  { %p472_p10 = pnand %p471_p9, %p465_p6 }
 0x119   :  { %475 = shalt.err (!%p472_p10)
}
 0x11a   :  { %307 = dma.vmem_to_hbm [thread:$0]  %s302_s2, 256, %s569_s5, [#allocation9], %s493_s21, %s493_s21, %s494_s22  }
 0x11b   :  { %488 = dma.done.wait [#allocation4], 256  }
 0x11c   :  { %489 = vsyncadd [#allocation4], 4294967040 }
 0x11d   :  { %490 = dma.done.wait [#allocation9], 512  }
 0x11e   :  { %491 = vsyncadd [#allocation9], 4294966784 }
 0x11f   :  { %317 = vsyncpa [#allocation3], 1 }
 0x120   :  { %318 = vsyncpa [#allocation6], 1 }
 0x121   :  { %319 = vsyncpa [#allocation4], 1 }
 0x122   :  { %320 = vsyncpa [#allocation9], 1 }

</bundles_post_ra>
